<compile_context>
chip_gen: v7x
topology: tpu7x:2x2x1
jax: 0.10.0
libtpu: 0.0.40
codegen_flags: <defaults>
</compile_context>

<pallas_src>
import jax
import jax.numpy as jnp
from jax.experimental import pallas as pl
from jax.experimental.pallas import tpu as pltpu


def _round_up(v, m):
    return ((v + m - 1) // m) * m


def fm_kernel(x_ref, rhs_ref, ws_ref, b_ref, o_ref):
    x = x_ref[...].astype(jnp.float32)                                   # (TB, n)

    # MXU: xr[:, :k] = x @ V; columns k..127 are exact zeros (zero-padded V),
    # so the unmasked square-sum equals sum_k (x @ V)^2.
    xr = jnp.dot(x, rhs_ref[...], preferred_element_type=jnp.float32)    # (TB, KP)
    out_1 = jnp.sum(xr * xr, axis=1, keepdims=True)                      # (TB, 1)

    w_row = ws_ref[0:1, :]                                               # (1, n) lin weight
    s_row = ws_ref[1:2, :]                                               # (1, n) rowsum(V^2)

    # out_lin(no bias) - 0.5*out_2 = sum_j x_j * (w_j - 0.5 * x_j * s_j)
    rest = jnp.sum(x * (w_row - 0.5 * (x * s_row)), axis=1, keepdims=True)

    o_ref[...] = (0.5 * out_1 + rest + b_ref[0, 0]).astype(o_ref.dtype)


def fm_precompute(V, lin_w, lin_b):
    """Grid-invariant operands. Cache the result when V / lin_* are static."""
    n, k = V.shape
    V = V.astype(jnp.float32)
    kpad = _round_up(max(k, 1), 128)
    rhs = jnp.pad(V, ((0, 0), (0, kpad - k)))               # (n, KP) lane-dense [V | 0]
    w_row = lin_w.reshape(1, n).astype(jnp.float32)
    s_row = jnp.sum(V * V, axis=1).reshape(1, n)            # rowsum(V^2)
    ws = jnp.concatenate([w_row, s_row], axis=0)            # (2, n)
    b = lin_b.reshape(1, 1).astype(jnp.float32)             # SMEM scalar
    return rhs, ws, b


def _build_call(TB, B, n, kpad, grid, vmem_limit, single_buffer_resident):
    res_kwargs = {}
    if single_buffer_resident and hasattr(pl, "Buffered"):
        # Constant index_map -> a single VMEM buffer is enough; frees VMEM for
        # a larger x tile (matters most on v7x's 64 MiB VMEM).
        res_kwargs["pipeline_mode"] = pl.Buffered(1)

    return pl.pallas_call(
        fm_kernel,
        out_shape=jax.ShapeDtypeStruct((B, 1), jnp.float32),
        grid=grid,
        in_specs=[
            pl.BlockSpec((TB, n), lambda i: (i, 0)),                      # x: batch-tiled
            pl.BlockSpec((n, kpad), lambda i: (0, 0), **res_kwargs),      # [V | 0]: resident
            pl.BlockSpec((2, n), lambda i: (0, 0), **res_kwargs),         # [w ; rowsum(V^2)]
            pl.BlockSpec(memory_space=pltpu.MemorySpace.SMEM),            # bias scalar
        ],
        out_specs=pl.BlockSpec((TB, 1), lambda i: (i, 0)),
        compiler_params=pltpu.CompilerParams(
            dimension_semantics=("parallel",),
            vmem_limit_bytes=vmem_limit,
        ),
    )


def torch_fm_forward(x, V, lin_w, lin_b, *, tb=512, params=None):
    """x: (B, n) any float dtype; V: (n, k); lin_w: (1, n) [PyTorch layout]; lin_b: (1,)."""
    B, n = x.shape
    n_v, _ = V.shape
    assert n_v == n

    if params is None:
        params = fm_precompute(V, lin_w, lin_b)
    rhs, ws, b_smem = params
    kpad = rhs.shape[1]

    # ---- generation-aware VMEM budget -----------------------------------
    try:
        vmem_cap = pltpu.get_tpu_info().vmem_capacity_bytes
    except Exception:
        vmem_cap = 64 * 1024 * 1024                 # conservative: v7x per-TC VMEM
    vmem_limit = min(int(vmem_cap * 0.7), 100 * 1024 * 1024)

    x_itemsize = x.dtype.itemsize                   # x is DMA'd at native dtype
    resident = 2 * 4 * (n * kpad + 2 * n)           # rhs + ws, worst-case double-buffered
    x_budget = max(vmem_limit - resident - (2 << 20), 1 << 20)
    tb_cap = max(8, (x_budget // (2 * n * x_itemsize)) // 8 * 8)

    # ---- batch tile ------------------------------------------------------
    TB = min(tb, _round_up(B, 8), tb_cap)
    TB = max(8, (TB // 8) * 8)
    if pl.cdiv(B, TB) < 2 and B > 8:
        # >=2 grid steps so the "parallel" batch axis feeds both TCs on v7x.
        TB = max(8, _round_up(pl.cdiv(B, 2), 8))
    grid = (pl.cdiv(B, TB),)                        # ragged final block handled by Pallas

    try:
        out_2d = _build_call(TB, B, n, kpad, grid, vmem_limit, True)(x, rhs, ws, b_smem)
    except Exception:
        # Fallback for jax versions where pl.Buffered(1) is not accepted.
        out_2d = _build_call(TB, B, n, kpad, grid, vmem_limit, False)(x, rhs, ws, b_smem)

    return out_2d[:, 0]                             # (B,) -- matches out.squeeze(dim=1)


def reference_forward(x, V, lin_w, lin_b):
    out_1 = jnp.sum(jnp.square(x @ V), axis=1, keepdims=True)
    out_2 = jnp.sum(jnp.square(x) @ jnp.square(V), axis=1, keepdims=True)
    out_inter = 0.5 * (out_1 - out_2)
    out_lin = x @ lin_w.T + lin_b
    return (out_inter + out_lin).squeeze(axis=1)


if __name__ == "__main__":
    # Small shapes consistent with TorchFM(n, k): x is (batch, n).
    # B=40 with tb=16 exercises multi-step batch tiling AND a ragged final
    # block (rows 32..39 valid, 40..47 masked) with no pad copy of x.
    B, n, k = 40, 32, 8

    key = jax.random.PRNGKey(0)
    kx, kv, kw, kb = jax.random.split(key, 4)

    x = jax.random.normal(kx, (B, n), dtype=jnp.float32)
    V = jax.random.normal(kv, (n, k), dtype=jnp.float32)    # nn.Parameter(randn(n, k))
    bound = 1.0 / jnp.sqrt(jnp.float32(n))                  # nn.Linear default init range
    lin_w = jax.random.uniform(kw, (1, n), minval=-bound, maxval=bound, dtype=jnp.float32)
    lin_b = jax.random.uniform(kb, (1,), minval=-bound, maxval=bound, dtype=jnp.float32)

    out = torch_fm_forward(x, V, lin_w, lin_b, tb=16)
    out = jax.block_until_ready(out)

    ref = reference_forward(x, V, lin_w, lin_b)
    assert out.shape == (B,), out.shape
    assert jnp.allclose(out, ref, atol=1e-3, rtol=1e-3), (out, ref)

    print("KERNEL_OK")
</pallas_src>

<mosaic_0001>
module attributes {stable_mosaic.version = 11 : i64} {
  func.func @fm_kernel(%arg0: i32, %arg1: memref<16x32xf32, #tpu.memory_space<vmem>>, %arg2: memref<32x128xf32, #tpu.memory_space<vmem>>, %arg3: memref<2x32xf32, #tpu.memory_space<vmem>>, %arg4: memref<1x1xf32, #tpu.memory_space<smem>>, %arg5: memref<16x1xf32, #tpu.memory_space<vmem>>) attributes {dimension_semantics = [#tpu.dimension_semantics<parallel>], iteration_bounds = array<i64: 3>, scalar_prefetch = 0 : i64, scratch_operands = 0 : i64, tpu.core_type = #tpu.core_type<tc>, window_params = [{transform_indices = @transform_0, window_bounds = array<i64: 16, 32>}, {pipeline_mode = #tpu.pipeline_mode<synchronous>, transform_indices = @transform_1, window_bounds = array<i64: 32, 128>}, {pipeline_mode = #tpu.pipeline_mode<synchronous>, transform_indices = @transform_2, window_bounds = array<i64: 2, 32>}, {transform_indices = @transform_3, window_bounds = array<i64: 1, 1>}, {transform_indices = @transform_4, window_bounds = array<i64: 16, 1>}]} {
    %c0 = arith.constant 0 : index
    %c0_0 = arith.constant 0 : index
    %0 = vector.load %arg1[%c0, %c0_0] : memref<16x32xf32, #tpu.memory_space<vmem>>, vector<16x32xf32>
    %c0_1 = arith.constant 0 : index
    %c0_2 = arith.constant 0 : index
    %1 = vector.load %arg2[%c0_1, %c0_2] : memref<32x128xf32, #tpu.memory_space<vmem>>, vector<32x128xf32>
    %cst = arith.constant dense<0.000000e+00> : vector<16x128xf32>
    %2 = tpu.matmul %0, %1, %cst {dimension_numbers = #tpu.dot_dimension_numbers<[1], [0], [0], [1], [0, 0, 1, 1], [], []>} : vector<16x32xf32>, vector<32x128xf32>, vector<16x128xf32> -> vector<16x128xf32>
    %3 = arith.mulf %2, %2 : vector<16x128xf32>
    %cst_3 = arith.constant dense<0.000000e+00> : vector<16xf32>
    %4 = vector.multi_reduction <add>, %3, %cst_3 [1] : vector<16x128xf32> to vector<16xf32>
    %5 = vector.shape_cast %4 : vector<16xf32> to vector<16x1xf32>
    %c0_4 = arith.constant 0 : index
    %c0_5 = arith.constant 0 : index
    %6 = vector.load %arg3[%c0_4, %c0_5] : memref<2x32xf32, #tpu.memory_space<vmem>>, vector<1x32xf32>
    %c1 = arith.constant 1 : index
    %c0_6 = arith.constant 0 : index
    %7 = vector.load %arg3[%c1, %c0_6] : memref<2x32xf32, #tpu.memory_space<vmem>>, vector<1x32xf32>
    %8 = vector.broadcast %7 : vector<1x32xf32> to vector<16x32xf32>
    %9 = arith.mulf %0, %8 : vector<16x32xf32>
    %cst_7 = arith.constant 5.000000e-01 : f32
    %10 = vector.broadcast %cst_7 : f32 to vector<16x32xf32>
    %11 = arith.mulf %10, %9 : vector<16x32xf32>
    %12 = vector.broadcast %6 : vector<1x32xf32> to vector<16x32xf32>
    %13 = arith.subf %12, %11 : vector<16x32xf32>
    %14 = arith.mulf %0, %13 : vector<16x32xf32>
    %cst_8 = arith.constant dense<0.000000e+00> : vector<16xf32>
    %15 = vector.multi_reduction <add>, %14, %cst_8 [1] : vector<16x32xf32> to vector<16xf32>
    %16 = vector.shape_cast %15 : vector<16xf32> to vector<16x1xf32>
    %cst_9 = arith.constant 5.000000e-01 : f32
    %17 = vector.broadcast %cst_9 : f32 to vector<16x1xf32>
    %18 = arith.mulf %17, %5 : vector<16x1xf32>
    %19 = arith.addf %18, %16 : vector<16x1xf32>
    %c0_10 = arith.constant 0 : index
    %c0_11 = arith.constant 0 : index
    %20 = memref.load %arg4[%c0_10, %c0_11] : memref<1x1xf32, #tpu.memory_space<smem>>
    %21 = vector.broadcast %20 : f32 to vector<16x1xf32>
    %22 = arith.addf %19, %21 : vector<16x1xf32>
    %c0_12 = arith.constant 0 : index
    %c0_13 = arith.constant 0 : index
    %23 = vector.load %arg5[%c0_12, %c0_13] : memref<16x1xf32, #tpu.memory_space<vmem>>, vector<16x1xf32>
    tpu.vector_store %arg5[%c0_12, %c0_13], %22 {strides = array<i32>} : memref<16x1xf32, #tpu.memory_space<vmem>>, vector<16x1xf32>,
    return
  }
  func.func @transform_0(%arg0: i32) -> (i32, i32) {
    %c0_i32 = arith.constant 0 : i32
    %c0_i32_0 = arith.constant 0 : i32
    return %arg0, %c0_i32 : i32, i32
  }
  func.func @transform_1(%arg0: i32) -> (i32, i32) {
    %c0_i32 = arith.constant 0 : i32
    %c0_i32_0 = arith.constant 0 : i32
    %c0_i32_1 = arith.constant 0 : i32
    return %c0_i32, %c0_i32_0 : i32, i32
  }
  func.func @transform_2(%arg0: i32) -> (i32, i32) {
    %c0_i32 = arith.constant 0 : i32
    %c0_i32_0 = arith.constant 0 : i32
    %c0_i32_1 = arith.constant 0 : i32
    return %c0_i32, %c0_i32_0 : i32, i32
  }
  func.func @transform_3(%arg0: i32) -> (i32, i32) {
    %c0_i32 = arith.constant 0 : i32
    %c0_i32_0 = arith.constant 0 : i32
    %c0_i32_1 = arith.constant 0 : i32
    return %c0_i32, %c0_i32_0 : i32, i32
  }
  func.func @transform_4(%arg0: i32) -> (i32, i32) {
    %c0_i32 = arith.constant 0 : i32
    %c0_i32_0 = arith.constant 0 : i32
    return %arg0, %c0_i32 : i32, i32
  }
}

module attributes {stable_mosaic.version = 11 : i64} {
  func.func @fm_kernel(%arg0: i32, %arg1: memref<16x32xf32, #tpu.memory_space<vmem>>, %arg2: memref<32x128xf32, #tpu.memory_space<vmem>>, %arg3: memref<2x32xf32, #tpu.memory_space<vmem>>, %arg4: memref<1x1xf32, #tpu.memory_space<smem>>, %arg5: memref<16x1xf32, #tpu.memory_space<vmem>>) attributes {dimension_semantics = [#tpu.dimension_semantics<parallel>], iteration_bounds = array<i64: 3>, scalar_prefetch = 0 : i64, scratch_operands = 0 : i64, tpu.core_type = #tpu.core_type<tc>, window_params = [{transform_indices = @transform_0, window_bounds = array<i64: 16, 32>}, {pipeline_mode = #tpu.pipeline_mode<synchronous>, transform_indices = @transform_1, window_bounds = array<i64: 32, 128>}, {pipeline_mode = #tpu.pipeline_mode<synchronous>, transform_indices = @transform_2, window_bounds = array<i64: 2, 32>}, {transform_indices = @transform_3, window_bounds = array<i64: 1, 1>}, {transform_indices = @transform_4, window_bounds = array<i64: 16, 1>}]} {
    %c0 = arith.constant 0 : index
    %c0_0 = arith.constant 0 : index
    %0 = vector.load %arg1[%c0, %c0_0] : memref<16x32xf32, #tpu.memory_space<vmem>>, vector<16x32xf32>
    %c0_1 = arith.constant 0 : index
    %c0_2 = arith.constant 0 : index
    %1 = vector.load %arg2[%c0_1, %c0_2] : memref<32x128xf32, #tpu.memory_space<vmem>>, vector<32x128xf32>
    %cst = arith.constant dense<0.000000e+00> : vector<16x128xf32>
    %2 = tpu.matmul %0, %1, %cst {dimension_numbers = #tpu.dot_dimension_numbers<[1], [0], [0], [1], [0, 0, 1, 1], [], []>} : vector<16x32xf32>, vector<32x128xf32>, vector<16x128xf32> -> vector<16x128xf32>
    %3 = arith.mulf %2, %2 : vector<16x128xf32>
    %cst_3 = arith.constant dense<0.000000e+00> : vector<16xf32>
    %4 = vector.multi_reduction <add>, %3, %cst_3 [1] : vector<16x128xf32> to vector<16xf32>
    %5 = vector.shape_cast %4 : vector<16xf32> to vector<16x1xf32>
    %c0_4 = arith.constant 0 : index
    %c0_5 = arith.constant 0 : index
    %6 = vector.load %arg3[%c0_4, %c0_5] : memref<2x32xf32, #tpu.memory_space<vmem>>, vector<1x32xf32>
    %c1 = arith.constant 1 : index
    %c0_6 = arith.constant 0 : index
    %7 = vector.load %arg3[%c1, %c0_6] : memref<2x32xf32, #tpu.memory_space<vmem>>, vector<1x32xf32>
    %8 = vector.broadcast %7 : vector<1x32xf32> to vector<16x32xf32>
    %9 = arith.mulf %0, %8 : vector<16x32xf32>
    %cst_7 = arith.constant 5.000000e-01 : f32
    %10 = vector.broadcast %cst_7 : f32 to vector<16x32xf32>
    %11 = arith.mulf %10, %9 : vector<16x32xf32>
    %12 = vector.broadcast %6 : vector<1x32xf32> to vector<16x32xf32>
    %13 = arith.subf %12, %11 : vector<16x32xf32>
    %14 = arith.mulf %0, %13 : vector<16x32xf32>
    %cst_8 = arith.constant dense<0.000000e+00> : vector<16xf32>
    %15 = vector.multi_reduction <add>, %14, %cst_8 [1] : vector<16x32xf32> to vector<16xf32>
    %16 = vector.shape_cast %15 : vector<16xf32> to vector<16x1xf32>
    %cst_9 = arith.constant 5.000000e-01 : f32
    %17 = vector.broadcast %cst_9 : f32 to vector<16x1xf32>
    %18 = arith.mulf %17, %5 : vector<16x1xf32>
    %19 = arith.addf %18, %16 : vector<16x1xf32>
    %c0_10 = arith.constant 0 : index
    %c0_11 = arith.constant 0 : index
    %20 = memref.load %arg4[%c0_10, %c0_11] : memref<1x1xf32, #tpu.memory_space<smem>>
    %21 = vector.broadcast %20 : f32 to vector<16x1xf32>
    %22 = arith.addf %19, %21 : vector<16x1xf32>
    %c0_12 = arith.constant 0 : index
    %c0_13 = arith.constant 0 : index
    %23 = vector.load %arg5[%c0_12, %c0_13] : memref<16x1xf32, #tpu.memory_space<vmem>>, vector<16x1xf32>
    tpu.vector_store %arg5[%c0_12, %c0_13], %22 {strides = array<i32>} : memref<16x1xf32, #tpu.memory_space<vmem>>, vector<16x1xf32>,
    return
  }
  func.func @transform_0(%arg0: i32) -> (i32, i32) {
    %c0_i32 = arith.constant 0 : i32
    %c0_i32_0 = arith.constant 0 : i32
    return %arg0, %c0_i32 : i32, i32
  }
  func.func @transform_1(%arg0: i32) -> (i32, i32) {
    %c0_i32 = arith.constant 0 : i32
    %c0_i32_0 = arith.constant 0 : i32
    %c0_i32_1 = arith.constant 0 : i32
    return %c0_i32, %c0_i32_0 : i32, i32
  }
  func.func @transform_2(%arg0: i32) -> (i32, i32) {
    %c0_i32 = arith.constant 0 : i32
    %c0_i32_0 = arith.constant 0 : i32
    %c0_i32_1 = arith.constant 0 : i32
    return %c0_i32, %c0_i32_0 : i32, i32
  }
  func.func @transform_3(%arg0: i32) -> (i32, i32) {
    %c0_i32 = arith.constant 0 : i32
    %c0_i32_0 = arith.constant 0 : i32
    %c0_i32_1 = arith.constant 0 : i32
    return %c0_i32, %c0_i32_0 : i32, i32
  }
  func.func @transform_4(%arg0: i32) -> (i32, i32) {
    %c0_i32 = arith.constant 0 : i32
    %c0_i32_0 = arith.constant 0 : i32
    return %arg0, %c0_i32 : i32, i32
  }
}

</mosaic_0001>

<bundles_post_ra>
// kernel: tpu_custom_call.1
= control target key start
LH: loop header
LB: loop body
LE: loop exit
PB: predicated region body
PF: predicated region fallthrough
CT: control target
= control target key end

     0   :  { %s933_s0 = inlined_call_operand.vmem [shape: f32[40,32], index: 0, kind: input, shape index: {}]   ;;  %s934_s1 = inlined_call_operand.vmem [shape: f32[32,128], index: 1, kind: input, shape index: {}]   ;;  %s935_s2 = inlined_call_operand.vmem [shape: f32[2,32], index: 2, kind: input, shape index: {}]   ;;  %s936_s3 = inlined_call_operand.<no memory space> [shape: f32[1,1], index: 3, kind: input, shape index: {}]   ;;  %s937_s4 = inlined_call_operand.vmem [shape: f32[40,1], index: 4, kind: output, shape index: {}]  }
   0x1   :  { %9 = sst [smem:[#allocation2]] %s936_s3 }
   0x2   :  { %s828_s17 = smov 0   ;;  %s830_s18 = smov 0  }
   0x3   :  { %s832_s19 = smov 0  }
   0x4 LB: > { %s841_s3 = sadd.s32 4294967295, %s766_s19   ;;  %s843_s20 = sadd.s32 1, %s766_s19   ;;  %s766_s19 = sphi %s832_s19, %s941_s19   ;;  %s762_s18 = sphi %s830_s18, %s940_s18   ;;  %s758_s17 = sphi %s828_s17, %s939_s17  }
   0x5   : > { %s108_s21 = ssub.s32 %s766_s19, %s843_s20  ;;  %s111_s22 = sadd.s32 1, %s762_s18 }
   0x6   : > { %p109_p0 = scmp.eq.s32.totalorder %s108_s21, 0  ;;  %p121_p1 = scmp.ne.s32.totalorder %s762_s18, %s758_s17 }
   0x7   : > { %p122_p2 = scmp.eq.s32.totalorder %s841_s3, 2  ;;  %p571_p3 = scmp.ge.s32.totalorder %s766_s19, 1 }
   0x8   : > { %s851_s23 = scalar_select %p109_p0, %s762_s18, %s111_s22  }
   0x9   : > { %p853_p4 = por %p122_p2, %p121_p1  ;;  %p172_p5 = scmp.lt.s32.totalorder %s766_s19, 4 }
   0xb   : > { %p173_p6 = pnand %p571_p3, %p172_p5 }
   0xc   : > { %v222_v0 = vld [vmem:[%s934_s1] sm:$0xff] (!%p173_p6)  ;;  %v223_v1 = vld [vmem:[%s934_s1 + $0x8] sm:$0xff] (!%p173_p6)  ;;  %v224_v2 = vld [vmem:[%s934_s1 + $0x10] sm:$0xff] (!%p173_p6)  ;;  %s867_s5 = sshll.u32 (!%p173_p6), %s841_s3, 1  ;;  %vm226_vm0 = vcmask (!%p173_p6), 261120   ;;  %s342_s19 = sld [smem:[#allocation2]] (!%p173_p6) }
   0xd   : > { %176 = sbr.rel (%p173_p6) target bundleno = 443 (0x1bb), region = 36  ;;  %v616_v3 = vpack.c.bf16 (!%p173_p6), %v223_v1, %v222_v0  ;;  %v225_v4 = vld [vmem:[%s934_s1 + $0x18] sm:$0xff] (!%p173_p6)  ;;  %p206_p7 = scmp.lt.s32.totalorder (!%p173_p6), %s867_s5, 4  ;;  %v577_v8 = vld [vmem:[%s935_s2 + $0x1] ss:$0 sm:$0xff] (!%p173_p6)  ;;  %vm346_vm1 = vcmask (!%p173_p6), 7168  }
   0xe   : > { %v620_v5 = vpack.c.bf16 (!%p173_p6), %v225_v4, %v224_v2  ;;  %v578_v12 = vld [vmem:[%s935_s2] ss:$0 sm:$0xff] (!%p173_p6)  ;;  %s198_s21 = sand.u32 (!%p173_p6), 1, %s758_s17  }
   0xf   : > { %617 = vmatprep.subr.bf16.mxu0 (!%p173_p6), %v616_v3  ;;  %s572_s22 = sshll.u32 (!%p173_p6), %s198_s21, 4 }
  0x10   : > { %619 = vmatpush3.bf16.msra.mxu0 (!%p173_p6), %v616_v3  ;;  %s888_s25 = scalar_lea.vmem (!%p173_p6), [#allocation3], %s572_s22  }
  0x11   : > { %621 = vmatprep.subr.bf16.mxu0 (!%p173_p6), %v620_v5 }
  0x12   : > { %v343_v27 = vstv (!%p173_p6), %s342_s19 }
  0x14   : > { %s207_s8 = scalar_select %p206_p7, %s867_s5, 4  ;;  %623 = vmatpush3.bf16.msra.mxu0 %v620_v5 }
  0x15   : > { %s357_s17 = ssub.s32 (%p853_p4), 5, %s867_s5  ;;  %s596_s26 = sshll.u32 (%p853_p4), %s841_s3, 4 }
  0x16   : > { %s574_s9 = sshll.u32 %s207_s8, 3  ;;  %p358_p8 = scmp.lt.s32.totalorder (%p853_p4), %s357_s17, 2 }
  0x17   : > { %s209_s12 = scalar_lea.vmem %s933_s0, %s574_s9  ;;  %s899_s29 = scalar_lea.vmem (%p853_p4), %s937_s4, %s596_s26  }
  0x18   : > { %v220_v6 = vld [vmem:[%s209_s12] sm:$0xff]  ;;  %v221_v7 = vld [vmem:[%s209_s12 + $0x8] sm:$0xff] }
  0x19   : > { %613 = vmatprep.mubr.msk.f32.mxu0 %vm226_vm0, %v220_v6  ;;  %v320_v9 = vmul.f32 %v577_v8, %v220_v6  ;;  %v321_v11 = vmul.f32 %v577_v8, %v221_v7 }
  0x1a   : > { %614 = vmatmul.mubr.msk.f32.vlgmr.msra.gmra.mrb[0].mxu0 %vm226_vm0, %v221_v7 }
  0x1b   : > { %v322_v10 = vmul.f32 0.5, %v320_v9  ;;  %v323_v13 = vmul.f32 0.5, %v321_v11 }
  0x1d   : > { %v328_v14 = vsub.f32 %v578_v12, %v322_v10  ;;  %v329_v17 = vsub.f32 %v578_v12, %v323_v13 }
  0x1f   : > { %v330_v15 = vmul.f32 %v328_v14, %v220_v6  ;;  %v331_v18 = vmul.f32 %v329_v17, %v221_v7 }
  0x21   : > { %v332_v16 = vsel %vm226_vm0, %v330_v15, 0.0  ;;  %v335_v19 = vsel %vm226_vm0, %v331_v18, 0.0 }
  0x22   : > { %333 = vadd.xlane.f32.xlu1 %v332_v16 }
  0x26   : > { %336 = vadd.xlane.f32.xlu1 %v335_v19 }
  0xaf   : > { %v334_v24 = vpop.xlane.xlu1 %333 }
  0xb3   : > { %v337_v30 = vpop.xlane.xlu1 %336 }
  0xed   : > { %v615_v20 = vpop.f32.mrb[0].mxu0 }
  0xee   : > { %v299_v21 = vpop.f32.mrb[1].mxu0  ;;  %v309_v23 = vmul.f32 %v615_v20, %v615_v20 }
  0xef   : > { %v308_v22 = vmul.f32 %v299_v21, %v299_v21 }
  0xf1   : > { %310 = vadd.xlane.f32.xlu0 %v308_v22 }
  0xf5   : > { %312 = vadd.xlane.f32.xlu0 %v309_v23 }
 0x17e   : > { %v311_v25 = vpop.xlane.xlu0 %310 }
 0x17f   : > { %v338_v26 = vmul.f32 0.5, %v311_v25 }
 0x181   : > { %v340_v28 = vadd.f32 %v338_v26, %v334_v24 }
 0x182   : > { %v313_v29 = vpop.xlane.xlu0 %312 }
 0x183   : > { %v344_v31 = vadd.f32 %v343_v27, %v340_v28  ;;  %v339_v32 = vmul.f32 0.5, %v313_v29  ;;  %355 = sbr.rel (!%p853_p4) target bundleno = 443 (0x1bb), region = 40 }
 0x185   : > { %347 = vst.msk [vmem:[%s888_s25] sm:$0xff] %vm346_vm1, %v344_v31  ;;  %v341_v33 = vadd.f32 %v339_v32, %v337_v30 }
 0x187   : > { %v345_v34 = vadd.f32 %v343_v27, %v341_v33 }
 0x189   : > { %348 = vst.msk [vmem:[%s888_s25 + $0x8] sm:$0xff] %vm346_vm1, %v345_v34 }
 0x18a   : > { %s943_s17 = smov (!%p358_p8, %s357_s17), 2 }
 0x18b   : > { %s581_s30 = sshll.u32 %s943_s17, 7 }
 0x18c   : > { %p584_p9 = scmp.eq.s32.totalorder %s581_s30, 0 }
 0x18d   : > { %s905_s6 = sshrl.u32 (!%p584_p9), %s943_s17, 1 }
 0x18e   : > { %366 = sbr.rel (%p584_p9) target bundleno = 443 (0x1bb), region = 44  ;;  %p585_p10 = scmp.le.s32.totalorder (!%p584_p9), %s905_s6, 0 }
 0x195   : > { %524 = sbr.rel (%p585_p10) target bundleno = 422 (0x1a6), region = 120  ;;  %s768_s3 = smov (!%p585_p10), %s899_s29  }
 0x196   : > { %s772_s24 = smov (!%p585_p10), %s888_s25   ;;  %s776_s5 = smov (!%p585_p10), 0  }
 0x197   : > { %s780_s7 = smov (!%p585_p10), 0  }
 0x19c LB: >> { %v430_v35 = vld [vmem:[%s774_s24] sm:$0xff]  ;;  %v432_v36 = vld [vmem:[%s774_s24 + $0x8] sm:$0xff]  ;;  %s434_s8 = sadd.s32 1, %s778_s5  ;;  %s424_s7 = sadd.s32 1, %s782_s7   ;;  %s782_s7 = sphi %s780_s7, %s424_s7   ;;  %s778_s5 = sphi %s776_s5, %s777_s5   ;;  %s774_s24 = sphi %s772_s24, %s439_s24   ;;  %s770_s3 = sphi %s768_s3, %s440_s3  }
 0x19d   : >> { %431 = vst [vmem:[%s770_s3] sm:$0xff] %v430_v35  ;;  %433 = vst [vmem:[%s770_s3 + $0x8] sm:$0xff] %v432_v36  ;;  %p435_p11 = scmp.ge.s32.totalorder %s434_s8, %s905_s6  ;;  %p423_p12 = scmp.ge.s32.totalorder %s424_s7, %s905_s6 }
 0x19f   : >> { %s945_s8 = smov (%p435_p11, %s434_s8), 0  ;;  %426 = sbr.rel (!%p423_p12) target bundleno = 412 (0x19c), region = 126 }
 0x1a0   : >> { %s586_s9 = sshll.u32 %s945_s8, 4  ;;  %s777_s5 = smov %s945_s8  }
 0x1a1   : >> { %s439_s24 = scalar_lea.vmem %s888_s25, %s586_s9 [#allocation3]   ;;  %s440_s3 = scalar_lea.vmem %s899_s29, %s586_s9  }
 0x1a6 PF: > { %s915_s10 = sand.u32 1, %s943_s17   ;;  %s597_s11 = sshll.u32 %s905_s6, 4 }
 0x1a7   : > { %s445_s12 = scalar_lea.vmem %s888_s25, %s597_s11 [#allocation3]   ;;  %s447_s13 = scalar_lea.vmem %s899_s29, %s597_s11  }
 0x1a8   : > { %p591_p13 = scmp.le.s32.totalorder %s915_s10, 0 }
 0x1a9   : > { %s784_s14 = smov (!%p591_p13), %s447_s13   ;;  %s788_s15 = smov (!%p591_p13), %s445_s12  }
 0x1aa   : > { %538 = sbr.rel (%p591_p13) target bundleno = 443 (0x1bb), region = 131  ;;  %s792_s16 = smov (!%p591_p13), 0  }
 0x1ab   : > { %s796_s19 = smov (!%p591_p13), 0  }
 0x1b1 LB: >> { %v457_v37 = vld [vmem:[%s790_s15] sm:$0xff]  ;;  %s459_s21 = sadd.s32 1, %s794_s16  ;;  %s451_s19 = sadd.s32 1, %s798_s19   ;;  %s798_s19 = sphi %s796_s19, %s451_s19   ;;  %s794_s16 = sphi %s792_s16, %s793_s16   ;;  %s790_s15 = sphi %s788_s15, %s464_s15   ;;  %s786_s14 = sphi %s784_s14, %s465_s14  }
 0x1b2   : >> { %458 = vst [vmem:[%s786_s14] sm:$0xff] %v457_v37  ;;  %p460_p0 = scmp.ge.s32.totalorder %s459_s21, %s915_s10  ;;  %p450_p1 = scmp.ge.s32.totalorder %s451_s19, %s915_s10 }
 0x1b4   : >> { %s947_s21 = smov (%p460_p0, %s459_s21), 0  ;;  %453 = sbr.rel (!%p450_p1) target bundleno = 433 (0x1b1), region = 137 }
 0x1b5   : >> { %s592_s22 = sshll.u32 %s947_s21, 3  ;;  %s793_s16 = smov %s947_s21  }
 0x1b6   : >> { %s464_s15 = scalar_lea.vmem %s445_s12, %s592_s22 [#allocation3]   ;;  %s465_s14 = scalar_lea.vmem %s447_s13, %s592_s22  }
 0x1bb PF: > { %p12_p2 = scmp.ge.s32.totalorder %s843_s20, 5   ;;  %s939_s17 = smov %s762_s18 }
 0x1bc   : > { %s940_s18 = smov %s851_s23  ;;  %s941_s19 = smov %s843_s20 }
 0x1bd   :  { %14 = sbr.rel (!%p12_p2) target bundleno = 4 (0x4), region = 148 }

// kernel: tpu_custom_call.1
= control target key start
LH: loop header
LB: loop body
LE: loop exit
PB: predicated region body
PF: predicated region fallthrough
CT: control target
= control target key end

     0   :  { %s933_s0 = inlined_call_operand.vmem [shape: f32[40,32], index: 0, kind: input, shape index: {}]   ;;  %s934_s1 = inlined_call_operand.vmem [shape: f32[32,128], index: 1, kind: input, shape index: {}]   ;;  %s935_s2 = inlined_call_operand.vmem [shape: f32[2,32], index: 2, kind: input, shape index: {}]   ;;  %s936_s3 = inlined_call_operand.<no memory space> [shape: f32[1,1], index: 3, kind: input, shape index: {}]   ;;  %s937_s4 = inlined_call_operand.vmem [shape: f32[40,1], index: 4, kind: output, shape index: {}]  }
   0x1   :  { %9 = sst [smem:[#allocation2]] %s936_s3 }
   0x2   :  { %s828_s17 = smov 0   ;;  %s830_s18 = smov 0  }
   0x3   :  { %s832_s19 = smov 0  }
   0x4 LB: > { %s841_s3 = sadd.s32 4294967295, %s766_s19   ;;  %s843_s20 = sadd.s32 1, %s766_s19   ;;  %s766_s19 = sphi %s832_s19, %s941_s19   ;;  %s762_s18 = sphi %s830_s18, %s940_s18   ;;  %s758_s17 = sphi %s828_s17, %s939_s17  }
   0x5   : > { %s108_s21 = ssub.s32 %s766_s19, %s843_s20  ;;  %s111_s22 = sadd.s32 1, %s762_s18 }
   0x6   : > { %p109_p0 = scmp.eq.s32.totalorder %s108_s21, 0  ;;  %p121_p1 = scmp.ne.s32.totalorder %s762_s18, %s758_s17 }
   0x7   : > { %p122_p2 = scmp.eq.s32.totalorder %s841_s3, 2  ;;  %p571_p3 = scmp.ge.s32.totalorder %s766_s19, 1 }
   0x8   : > { %s851_s23 = scalar_select %p109_p0, %s762_s18, %s111_s22  }
   0x9   : > { %p853_p4 = por %p122_p2, %p121_p1  ;;  %p172_p5 = scmp.lt.s32.totalorder %s766_s19, 4 }
   0xb   : > { %p173_p6 = pnand %p571_p3, %p172_p5 }
   0xc   : > { %v222_v0 = vld [vmem:[%s934_s1] sm:$0xff] (!%p173_p6)  ;;  %v223_v1 = vld [vmem:[%s934_s1 + $0x8] sm:$0xff] (!%p173_p6)  ;;  %v224_v2 = vld [vmem:[%s934_s1 + $0x10] sm:$0xff] (!%p173_p6)  ;;  %s867_s5 = sshll.u32 (!%p173_p6), %s841_s3, 1  ;;  %vm226_vm0 = vcmask (!%p173_p6), 261120   ;;  %s342_s19 = sld [smem:[#allocation2]] (!%p173_p6) }
   0xd   : > { %176 = sbr.rel (%p173_p6) target bundleno = 443 (0x1bb), region = 36  ;;  %v616_v3 = vpack.c.bf16 (!%p173_p6), %v223_v1, %v222_v0  ;;  %v225_v4 = vld [vmem:[%s934_s1 + $0x18] sm:$0xff] (!%p173_p6)  ;;  %p206_p7 = scmp.lt.s32.totalorder (!%p173_p6), %s867_s5, 4  ;;  %v577_v8 = vld [vmem:[%s935_s2 + $0x1] ss:$0 sm:$0xff] (!%p173_p6)  ;;  %vm346_vm1 = vcmask (!%p173_p6), 7168  }
   0xe   : > { %v620_v5 = vpack.c.bf16 (!%p173_p6), %v225_v4, %v224_v2  ;;  %v578_v12 = vld [vmem:[%s935_s2] ss:$0 sm:$0xff] (!%p173_p6)  ;;  %s198_s21 = sand.u32 (!%p173_p6), 1, %s758_s17  }
   0xf   : > { %617 = vmatprep.subr.bf16.mxu0 (!%p173_p6), %v616_v3  ;;  %s572_s22 = sshll.u32 (!%p173_p6), %s198_s21, 4 }
  0x10   : > { %619 = vmatpush3.bf16.msra.mxu0 (!%p173_p6), %v616_v3  ;;  %s888_s25 = scalar_lea.vmem (!%p173_p6), [#allocation3], %s572_s22  }
  0x11   : > { %621 = vmatprep.subr.bf16.mxu0 (!%p173_p6), %v620_v5 }
  0x12   : > { %v343_v27 = vstv (!%p173_p6), %s342_s19 }
  0x14   : > { %s207_s8 = scalar_select %p206_p7, %s867_s5, 4  ;;  %623 = vmatpush3.bf16.msra.mxu0 %v620_v5 }
  0x15   : > { %s357_s17 = ssub.s32 (%p853_p4), 5, %s867_s5  ;;  %s596_s26 = sshll.u32 (%p853_p4), %s841_s3, 4 }
  0x16   : > { %s574_s9 = sshll.u32 %s207_s8, 3  ;;  %p358_p8 = scmp.lt.s32.totalorder (%p853_p4), %s357_s17, 2 }
  0x17   : > { %s209_s12 = scalar_lea.vmem %s933_s0, %s574_s9  ;;  %s899_s29 = scalar_lea.vmem (%p853_p4), %s937_s4, %s596_s26  }
  0x18   : > { %v220_v6 = vld [vmem:[%s209_s12] sm:$0xff]  ;;  %v221_v7 = vld [vmem:[%s209_s12 + $0x8] sm:$0xff] }
  0x19   : > { %613 = vmatprep.mubr.msk.f32.mxu0 %vm226_vm0, %v220_v6  ;;  %v320_v9 = vmul.f32 %v577_v8, %v220_v6  ;;  %v321_v11 = vmul.f32 %v577_v8, %v221_v7 }
  0x1a   : > { %614 = vmatmul.mubr.msk.f32.vlgmr.msra.gmra.mrb[0].mxu0 %vm226_vm0, %v221_v7 }
  0x1b   : > { %v322_v10 = vmul.f32 0.5, %v320_v9  ;;  %v323_v13 = vmul.f32 0.5, %v321_v11 }
  0x1d   : > { %v328_v14 = vsub.f32 %v578_v12, %v322_v10  ;;  %v329_v17 = vsub.f32 %v578_v12, %v323_v13 }
  0x1f   : > { %v330_v15 = vmul.f32 %v328_v14, %v220_v6  ;;  %v331_v18 = vmul.f32 %v329_v17, %v221_v7 }
  0x21   : > { %v332_v16 = vsel %vm226_vm0, %v330_v15, 0.0  ;;  %v335_v19 = vsel %vm226_vm0, %v331_v18, 0.0 }
  0x22   : > { %333 = vadd.xlane.f32.xlu1 %v332_v16 }
  0x26   : > { %336 = vadd.xlane.f32.xlu1 %v335_v19 }
  0xaf   : > { %v334_v24 = vpop.xlane.xlu1 %333 }
  0xb3   : > { %v337_v30 = vpop.xlane.xlu1 %336 }
  0xed   : > { %v615_v20 = vpop.f32.mrb[0].mxu0 }
  0xee   : > { %v299_v21 = vpop.f32.mrb[1].mxu0  ;;  %v309_v23 = vmul.f32 %v615_v20, %v615_v20 }
  0xef   : > { %v308_v22 = vmul.f32 %v299_v21, %v299_v21 }
  0xf1   : > { %310 = vadd.xlane.f32.xlu0 %v308_v22 }
  0xf5   : > { %312 = vadd.xlane.f32.xlu0 %v309_v23 }
 0x17e   : > { %v311_v25 = vpop.xlane.xlu0 %310 }
 0x17f   : > { %v338_v26 = vmul.f32 0.5, %v311_v25 }
 0x181   : > { %v340_v28 = vadd.f32 %v338_v26, %v334_v24 }
 0x182   : > { %v313_v29 = vpop.xlane.xlu0 %312 }
 0x183   : > { %v344_v31 = vadd.f32 %v343_v27, %v340_v28  ;;  %v339_v32 = vmul.f32 0.5, %v313_v29  ;;  %355 = sbr.rel (!%p853_p4) target bundleno = 443 (0x1bb), region = 40 }
 0x185   : > { %347 = vst.msk [vmem:[%s888_s25] sm:$0xff] %vm346_vm1, %v344_v31  ;;  %v341_v33 = vadd.f32 %v339_v32, %v337_v30 }
 0x187   : > { %v345_v34 = vadd.f32 %v343_v27, %v341_v33 }
 0x189   : > { %348 = vst.msk [vmem:[%s888_s25 + $0x8] sm:$0xff] %vm346_vm1, %v345_v34 }
 0x18a   : > { %s943_s17 = smov (!%p358_p8, %s357_s17), 2 }
 0x18b   : > { %s581_s30 = sshll.u32 %s943_s17, 7 }
 0x18c   : > { %p584_p9 = scmp.eq.s32.totalorder %s581_s30, 0 }
 0x18d   : > { %s905_s6 = sshrl.u32 (!%p584_p9), %s943_s17, 1 }
 0x18e   : > { %366 = sbr.rel (%p584_p9) target bundleno = 443 (0x1bb), region = 44  ;;  %p585_p10 = scmp.le.s32.totalorder (!%p584_p9), %s905_s6, 0 }
 0x195   : > { %524 = sbr.rel (%p585_p10) target bundleno = 422 (0x1a6), region = 120  ;;  %s768_s3 = smov (!%p585_p10), %s899_s29  }
 0x196   : > { %s772_s24 = smov (!%p585_p10), %s888_s25   ;;  %s776_s5 = smov (!%p585_p10), 0  }
 0x197   : > { %s780_s7 = smov (!%p585_p10), 0  }
 0x19c LB: >> { %v430_v35 = vld [vmem:[%s774_s24] sm:$0xff]  ;;  %v432_v36 = vld [vmem:[%s774_s24 + $0x8] sm:$0xff]  ;;  %s434_s8 = sadd.s32 1, %s778_s5  ;;  %s424_s7 = sadd.s32 1, %s782_s7   ;;  %s782_s7 = sphi %s780_s7, %s424_s7   ;;  %s778_s5 = sphi %s776_s5, %s777_s5   ;;  %s774_s24 = sphi %s772_s24, %s439_s24   ;;  %s770_s3 = sphi %s768_s3, %s440_s3  }
 0x19d   : >> { %431 = vst [vmem:[%s770_s3] sm:$0xff] %v430_v35  ;;  %433 = vst [vmem:[%s770_s3 + $0x8] sm:$0xff] %v432_v36  ;;  %p435_p11 = scmp.ge.s32.totalorder %s434_s8, %s905_s6  ;;  %p423_p12 = scmp.ge.s32.totalorder %s424_s7, %s905_s6 }
 0x19f   : >> { %s945_s8 = smov (%p435_p11, %s434_s8), 0  ;;  %426 = sbr.rel (!%p423_p12) target bundleno = 412 (0x19c), region = 126 }
 0x1a0   : >> { %s586_s9 = sshll.u32 %s945_s8, 4  ;;  %s777_s5 = smov %s945_s8  }
 0x1a1   : >> { %s439_s24 = scalar_lea.vmem %s888_s25, %s586_s9 [#allocation3]   ;;  %s440_s3 = scalar_lea.vmem %s899_s29, %s586_s9  }
 0x1a6 PF: > { %s915_s10 = sand.u32 1, %s943_s17   ;;  %s597_s11 = sshll.u32 %s905_s6, 4 }
 0x1a7   : > { %s445_s12 = scalar_lea.vmem %s888_s25, %s597_s11 [#allocation3]   ;;  %s447_s13 = scalar_lea.vmem %s899_s29, %s597_s11  }
 0x1a8   : > { %p591_p13 = scmp.le.s32.totalorder %s915_s10, 0 }
 0x1a9   : > { %s784_s14 = smov (!%p591_p13), %s447_s13   ;;  %s788_s15 = smov (!%p591_p13), %s445_s12  }
 0x1aa   : > { %538 = sbr.rel (%p591_p13) target bundleno = 443 (0x1bb), region = 131  ;;  %s792_s16 = smov (!%p591_p13), 0  }
 0x1ab   : > { %s796_s19 = smov (!%p591_p13), 0  }
 0x1b1 LB: >> { %v457_v37 = vld [vmem:[%s790_s15] sm:$0xff]  ;;  %s459_s21 = sadd.s32 1, %s794_s16  ;;  %s451_s19 = sadd.s32 1, %s798_s19   ;;  %s798_s19 = sphi %s796_s19, %s451_s19   ;;  %s794_s16 = sphi %s792_s16, %s793_s16   ;;  %s790_s15 = sphi %s788_s15, %s464_s15   ;;  %s786_s14 = sphi %s784_s14, %s465_s14  }
 0x1b2   : >> { %458 = vst [vmem:[%s786_s14] sm:$0xff] %v457_v37  ;;  %p460_p0 = scmp.ge.s32.totalorder %s459_s21, %s915_s10  ;;  %p450_p1 = scmp.ge.s32.totalorder %s451_s19, %s915_s10 }
 0x1b4   : >> { %s947_s21 = smov (%p460_p0, %s459_s21), 0  ;;  %453 = sbr.rel (!%p450_p1) target bundleno = 433 (0x1b1), region = 137 }
 0x1b5   : >> { %s592_s22 = sshll.u32 %s947_s21, 3  ;;  %s793_s16 = smov %s947_s21  }
 0x1b6   : >> { %s464_s15 = scalar_lea.vmem %s445_s12, %s592_s22 [#allocation3]   ;;  %s465_s14 = scalar_lea.vmem %s447_s13, %s592_s22  }
 0x1bb PF: > { %p12_p2 = scmp.ge.s32.totalorder %s843_s20, 5   ;;  %s939_s17 = smov %s762_s18 }
 0x1bc   : > { %s940_s18 = smov %s851_s23  ;;  %s941_s19 = smov %s843_s20 }
 0x1bd   :  { %14 = sbr.rel (!%p12_p2) target bundleno = 4 (0x4), region = 148 }

</bundles_post_ra>
